<compile_context>
chip_gen: v6e
topology: v6e:2x2x1
jax: 0.10.0
libtpu: 0.0.40
codegen_flags: <defaults>
</compile_context>

<pallas_src>
import functools
from typing import NamedTuple, Optional

import jax
import jax.numpy as jnp
from jax.experimental import pallas as pl
from jax.experimental.pallas import tpu as pltpu


def _round_up(x: int, m: int) -> int:
    return (x + m - 1) // m * m


# --------------------------------------------------------------------------------------
# Parameter preparation (hoisted out of the per-call path).
# --------------------------------------------------------------------------------------
class ResidualParams(NamedTuple):
    w: jax.Array      # [in_pad, out_pad]  W.T, zero padded to 128 multiples
    f: jax.Array      # [in_pad, out_pad]  residual routing matrix (F[i, i % out_dim] = 1)
    b: jax.Array      # [1, out_pad]       bias (always f32), zero padded
    in_dim: int
    out_dim: int


def prepare_residual_params(w, b, *, dtype=jnp.float32) -> ResidualParams:
    """One-time pad + transpose of the Linear params; w: [out_dim, in_dim], b: [out_dim]."""
    out_dim, in_dim = w.shape
    assert b.shape == (out_dim,)
    if in_dim < out_dim and (out_dim - in_dim + 1) * in_dim != out_dim:
        # torch's expand branch would raise on the x + fx add for these shapes.
        raise ValueError(
            f"Residual expand branch is shape-inconsistent for in_dim={in_dim}, "
            f"out_dim={out_dim} (the PyTorch module would raise).")

    in_pad = _round_up(in_dim, 128)
    out_pad = _round_up(out_dim, 128)

    w_p = jnp.zeros((in_pad, out_pad), dtype).at[:in_dim, :out_dim].set(
        jnp.asarray(w, dtype).T)
    # Residual routing matrix covers all three branches (identity / zero-extension / fold):
    # residual = x @ F, computed on the MXU alongside the Linear matmul.
    rows = jnp.arange(in_dim)
    f_p = jnp.zeros((in_pad, out_pad), dtype).at[rows, rows % out_dim].set(1.0)
    b_p = jnp.zeros((1, out_pad), jnp.float32).at[0, :out_dim].set(
        jnp.asarray(b, jnp.float32))
    return ResidualParams(w_p, f_p, b_p, in_dim, out_dim)


# --------------------------------------------------------------------------------------
# Kernel: one (tm, tn) output block; K-reduction over grid axis 2.
# --------------------------------------------------------------------------------------
def _residual_kernel(x_ref, w_ref, f_ref, b_ref, o_ref, acc_ref, res_ref):
    k = pl.program_id(2)

    @pl.when(k == 0)
    def _():
        acc_ref[...] = jnp.zeros_like(acc_ref)
        res_ref[...] = jnp.zeros_like(res_ref)

    x = x_ref[...]
    # Linear part (goes through ReLU) and residual part (does not) accumulate separately.
    acc_ref[...] += jnp.dot(x, w_ref[...], preferred_element_type=jnp.float32)
    res_ref[...] += jnp.dot(x, f_ref[...], preferred_element_type=jnp.float32)

    @pl.when(k == pl.num_programs(2) - 1)
    def _():
        fx = jnp.maximum(acc_ref[...] + b_ref[...], 0.0)
        o_ref[...] = (res_ref[...] + fx).astype(o_ref.dtype)


# --------------------------------------------------------------------------------------
# Tile selection helpers (Python / setup time).
# --------------------------------------------------------------------------------------
def _vmem_capacity_bytes() -> int:
    try:
        return int(pltpu.get_tpu_info().vmem_capacity_bytes)
    except Exception:
        return 64 * 1024 * 1024  # conservative (v7x per-TC VMEM)


def _pick_feature_tile(dim_pad: int, want: int) -> int:
    """Largest multiple of 128 that divides dim_pad and is <= want (dim_pad % 128 == 0)."""
    t = max(128, (min(want, dim_pad) // 128) * 128)
    while dim_pad % t != 0:
        t -= 128
    return t


# --------------------------------------------------------------------------------------
# Jitted forward implementation (tiles / limits are static arguments).
# --------------------------------------------------------------------------------------
@functools.partial(
    jax.jit,
    static_argnames=("in_dim", "out_dim", "tm", "tn", "tk", "b_padded", "vmem_limit"))
def _residual_call(x, w_p, f_p, b_p, *, in_dim, out_dim, tm, tn, tk, b_padded,
                   vmem_limit: Optional[int]):
    B = x.shape[0]
    in_pad, out_pad = w_p.shape
    cdt = w_p.dtype
    out_dtype = x.dtype

    grid_m = b_padded // tm
    grid_n = out_pad // tn
    grid_k = in_pad // tk

    # Fast path: no padding kernel when x is already tile-aligned and in the compute dtype.
    if B == b_padded and in_dim == in_pad and x.dtype == cdt:
        x_p = x
    else:
        x_p = jnp.zeros((b_padded, in_pad), cdt).at[:B, :in_dim].set(x.astype(cdt))

    # Resident W/F (constant index_map) can be single-buffered; only bother when the
    # footprint is large enough to matter, keeping the common small-layer path on defaults.
    resident_wf = (grid_n == 1 and grid_k == 1)
    single_buffer = resident_wf and (w_p.size * w_p.dtype.itemsize > (2 << 20))
    if single_buffer:
        w_spec = pl.BlockSpec((tk, tn), lambda i, j, k: (k, j), pipeline_mode=pl.Buffered(1))
        f_spec = pl.BlockSpec((tk, tn), lambda i, j, k: (k, j), pipeline_mode=pl.Buffered(1))
    else:
        w_spec = pl.BlockSpec((tk, tn), lambda i, j, k: (k, j))
        f_spec = pl.BlockSpec((tk, tn), lambda i, j, k: (k, j))

    compiler_kwargs = dict(dimension_semantics=("parallel", "parallel", "arbitrary"))
    if vmem_limit is not None:
        compiler_kwargs["vmem_limit_bytes"] = int(vmem_limit)

    cost = pl.CostEstimate(
        flops=2 * 2 * b_padded * in_pad * out_pad,  # Linear matmul + residual routing matmul
        transcendentals=0,
        bytes_accessed=(x_p.size * x_p.dtype.itemsize
                        + (w_p.size + f_p.size) * w_p.dtype.itemsize
                        + b_p.size * 4
                        + b_padded * out_pad * jnp.dtype(out_dtype).itemsize))

    out_p = pl.pallas_call(
        _residual_kernel,
        out_shape=jax.ShapeDtypeStruct((b_padded, out_pad), out_dtype),
        grid=(grid_m, grid_n, grid_k),
        in_specs=[
            pl.BlockSpec((tm, tk), lambda i, j, k: (i, k)),   # x tile, streamed
            w_spec,                                           # W block
            f_spec,                                           # residual routing block
            pl.BlockSpec((1, tn), lambda i, j, k: (0, j)),    # bias block
        ],
        out_specs=pl.BlockSpec((tm, tn), lambda i, j, k: (i, j)),
        scratch_shapes=[pltpu.VMEM((tm, tn), jnp.float32),    # Linear accumulator
                        pltpu.VMEM((tm, tn), jnp.float32)],   # residual accumulator
        compiler_params=pltpu.CompilerParams(**compiler_kwargs),
        cost_estimate=cost,
    )(x_p, w_p, f_p, b_p)

    if b_padded == B and out_pad == out_dim:
        return out_p
    return out_p[:B, :out_dim]


# --------------------------------------------------------------------------------------
# Public wrapper: tile selection + VMEM budgeting, then the jitted call.
# --------------------------------------------------------------------------------------
def residual_forward(x, params: ResidualParams, *, tile_m=512, tile_n=512, tile_k=512):
    """out = match_dimensions(x) + relu(x @ W.T + b);  x: [B, in_dim] -> [B, out_dim]."""
    B, in_dim = x.shape
    assert in_dim == params.in_dim
    in_pad, out_pad = params.w.shape
    ebytes = jnp.dtype(params.w.dtype).itemsize
    obytes = jnp.dtype(x.dtype).itemsize

    # Batch tile: keep grid_m >= 2 whenever B allows so both v7x TensorCores get work and
    # the double-buffered pipeline has something to overlap.
    tm = max(8, min(_round_up(tile_m, 8), _round_up((B + 1) // 2, 8)))
    tk = _pick_feature_tile(in_pad, tile_k)
    tn = _pick_feature_tile(out_pad, tile_n)

    # Generation-aware VMEM ceiling: ~51 MiB on v7x (64 MiB physical), ~102 MiB on v5e/v6e.
    cap = int(0.8 * _vmem_capacity_bytes())

    def budget(tm_, tk_, tn_):
        gn, gk = out_pad // tn_, in_pad // tk_
        wf_bufs = 1 if (gn == 1 and gk == 1) else 2   # streamed W/F are double-buffered
        b_bufs = 1 if gn == 1 else 2
        return (ebytes * (2 * tm_ * tk_ + 2 * wf_bufs * tk_ * tn_)   # x (dbl) + W + F
                + 4 * b_bufs * tn_                                    # bias
                + obytes * 2 * tm_ * tn_                              # out (dbl)
                + 4 * 2 * tm_ * tn_)                                  # two f32 accumulators

    while budget(tm, tk, tn) > cap and (tk > 128 or tn > 128 or tm > 8):
        if tk >= tn and tk > 128:
            tk = _pick_feature_tile(in_pad, tk // 2)
        elif tn > 128:
            tn = _pick_feature_tile(out_pad, tn // 2)
        else:
            tm = max(8, _round_up(tm // 2, 8))

    b_padded = _round_up(B, tm)
    need = budget(tm, tk, tn)
    vmem_limit = None
    if need > 12 * 1024 * 1024:   # only raise the scoped-VMEM limit when tiles need it
        vmem_limit = min(cap, max(32 * 1024 * 1024, int(1.3 * need)))

    # TODO(synk): for in_dim == out_dim the residual could skip the F stream entirely
    # (add the x block directly when tk == tn and k == j), saving weight-side HBM traffic
    # for very large square layers.
    return _residual_call(
        x, params.w, params.f, params.b,
        in_dim=in_dim, out_dim=params.out_dim,
        tm=tm, tn=tn, tk=tk, b_padded=b_padded, vmem_limit=vmem_limit)


# --------------------------------------------------------------------------------------
# Pure-JAX reference mirroring the PyTorch module, and a small self-test.
# --------------------------------------------------------------------------------------
def _reference(x, w, b):
    fx = jnp.maximum(
        jnp.matmul(x, w.T, precision=jax.lax.Precision.HIGHEST) + b[None, :], 0.0)
    in_dim, out_dim = x.shape[-1], fx.shape[-1]
    if in_dim == out_dim:
        xm = x
    elif in_dim < out_dim:
        xm = jnp.concatenate([x] + [jnp.zeros_like(x)] * (out_dim - in_dim), axis=-1)
    else:
        folded = jnp.zeros(x.shape[:-1] + (out_dim,), x.dtype)
        for i in range(in_dim):
            folded = folded.at[..., i % out_dim].add(x[..., i])
        xm = folded
    return xm + fx


if __name__ == "__main__":
    root = jax.random.PRNGKey(0)

    def make_case(key, B, in_dim, out_dim):
        k1, k2, k3 = jax.random.split(key, 3)
        x = jax.random.normal(k1, (B, in_dim), jnp.float32)
        w = jax.random.normal(k2, (out_dim, in_dim), jnp.float32) / jnp.sqrt(float(in_dim))
        b = jax.random.normal(k3, (out_dim,), jnp.float32) * 0.1
        return x, w, b

    keys = jax.random.split(root, 4)

    # 1) fold path (in_dim > out_dim), two streamed batch tiles.
    x, w, b = make_case(keys[0], 256, 32, 16)
    p = prepare_residual_params(w, b)
    out = residual_forward(x, p, tile_m=128)
    jax.block_until_ready(out)
    assert out.shape == (256, 16)
    assert jnp.allclose(out, _reference(x, w, b), atol=1e-5, rtol=1e-5), "fold mismatch"

    # 2) identity-residual path (in_dim == out_dim).
    x, w, b = make_case(keys[1], 64, 32, 32)
    p = prepare_residual_params(w, b)
    out = residual_forward(x, p)
    jax.block_until_ready(out)
    assert out.shape == (64, 32)
    assert jnp.allclose(out, _reference(x, w, b), atol=1e-5, rtol=1e-5), "equal mismatch"

    # 3) expand path (in_dim < out_dim; torch is only shape-consistent for in_dim == 1).
    x, w, b = make_case(keys[2], 16, 1, 8)
    p = prepare_residual_params(w, b)
    out = residual_forward(x, p)
    jax.block_until_ready(out)
    assert out.shape == (16, 8)
    assert jnp.allclose(out, _reference(x, w, b), atol=1e-5, rtol=1e-5), "expand mismatch"

    # 4) fold path on a multi-block (M, N, K) grid -> exercises the streamed-W accumulator.
    x, w, b = make_case(keys[3], 96, 200, 136)
    p = prepare_residual_params(w, b)
    out = residual_forward(x, p, tile_m=32, tile_n=128, tile_k=128)
    jax.block_until_ready(out)
    assert out.shape == (96, 136)
    assert jnp.allclose(out, _reference(x, w, b), atol=1e-4, rtol=1e-4), "tiled mismatch"

    # 5) bf16 storage path (halves HBM traffic; f32 MXU accumulation), looser tolerance.
    x, w, b = make_case(keys[1], 64, 32, 32)
    p16 = prepare_residual_params(w, b, dtype=jnp.bfloat16)
    out16 = residual_forward(x, p16)
    jax.block_until_ready(out16)
    assert out16.dtype == jnp.float32 and out16.shape == (64, 32)
    assert jnp.allclose(out16, _reference(x, w, b), atol=5e-2, rtol=5e-2), "bf16 mismatch"

    print("KERNEL_OK")
</pallas_src>

<mosaic_0001>
module attributes {stable_mosaic.version = 11 : i64} {
  func.func @_residual_kernel(%arg0: i32, %arg1: i32, %arg2: i32, %arg3: memref<128x128xf32, #tpu.memory_space<vmem>>, %arg4: memref<128x128xf32, #tpu.memory_space<vmem>>, %arg5: memref<128x128xf32, #tpu.memory_space<vmem>>, %arg6: memref<1x128xf32, #tpu.memory_space<vmem>>, %arg7: memref<128x128xf32, #tpu.memory_space<vmem>>, %arg8: memref<128x128xf32, #tpu.memory_space<vmem>>, %arg9: memref<128x128xf32, #tpu.memory_space<vmem>>) attributes {dimension_semantics = [#tpu.dimension_semantics<parallel>, #tpu.dimension_semantics<parallel>, #tpu.dimension_semantics<arbitrary>], iteration_bounds = array<i64: 2, 1, 1>, scalar_prefetch = 0 : i64, scratch_operands = 2 : i64, tpu.core_type = #tpu.core_type<tc>, window_params = [{transform_indices = @transform_0, window_bounds = array<i64: 128, 128>}, {transform_indices = @transform_1, window_bounds = array<i64: 128, 128>}, {transform_indices = @transform_2, window_bounds = array<i64: 128, 128>}, {transform_indices = @transform_3, window_bounds = array<i64: 1, 128>}, {transform_indices = @transform_4, window_bounds = array<i64: 128, 128>}]} {
    %c0_i32 = arith.constant 0 : i32
    %0 = arith.cmpi eq, %arg2, %c0_i32 : i32
    %1 = arith.extui %0 : i1 to i32
    %c0_i32_0 = arith.constant 0 : i32
    %2 = arith.cmpi ne, %1, %c0_i32_0 : i32
    scf.if %2 {
      %cst_17 = arith.constant 0.000000e+00 : f32
      %17 = vector.broadcast %cst_17 : f32 to vector<128x128xf32>
      %c0_18 = arith.constant 0 : index
      %c0_19 = arith.constant 0 : index
      %18 = vector.load %arg8[%c0_18, %c0_19] : memref<128x128xf32, #tpu.memory_space<vmem>>, vector<128x128xf32>
      tpu.vector_store %arg8[%c0_18, %c0_19], %17 {strides = array<i32>} : memref<128x128xf32, #tpu.memory_space<vmem>>, vector<128x128xf32>,
      %cst_20 = arith.constant 0.000000e+00 : f32
      %19 = vector.broadcast %cst_20 : f32 to vector<128x128xf32>
      %c0_21 = arith.constant 0 : index
      %c0_22 = arith.constant 0 : index
      %20 = vector.load %arg9[%c0_21, %c0_22] : memref<128x128xf32, #tpu.memory_space<vmem>>, vector<128x128xf32>
      tpu.vector_store %arg9[%c0_21, %c0_22], %19 {strides = array<i32>} : memref<128x128xf32, #tpu.memory_space<vmem>>, vector<128x128xf32>,
    } else {
    }
    %c0 = arith.constant 0 : index
    %c0_1 = arith.constant 0 : index
    %3 = vector.load %arg3[%c0, %c0_1] : memref<128x128xf32, #tpu.memory_space<vmem>>, vector<128x128xf32>
    %c0_2 = arith.constant 0 : index
    %c0_3 = arith.constant 0 : index
    %4 = vector.load %arg8[%c0_2, %c0_3] : memref<128x128xf32, #tpu.memory_space<vmem>>, vector<128x128xf32>
    %c0_4 = arith.constant 0 : index
    %c0_5 = arith.constant 0 : index
    %5 = vector.load %arg4[%c0_4, %c0_5] : memref<128x128xf32, #tpu.memory_space<vmem>>, vector<128x128xf32>
    %cst = arith.constant dense<0.000000e+00> : vector<128x128xf32>
    %6 = tpu.matmul %3, %5, %cst {dimension_numbers = #tpu.dot_dimension_numbers<[1], [0], [0], [1], [0, 0, 1, 1], [], []>} : vector<128x128xf32>, vector<128x128xf32>, vector<128x128xf32> -> vector<128x128xf32>
    %7 = arith.addf %4, %6 : vector<128x128xf32>
    %c0_6 = arith.constant 0 : index
    %c0_7 = arith.constant 0 : index
    %8 = vector.load %arg8[%c0_6, %c0_7] : memref<128x128xf32, #tpu.memory_space<vmem>>, vector<128x128xf32>
    tpu.vector_store %arg8[%c0_6, %c0_7], %7 {strides = array<i32>} : memref<128x128xf32, #tpu.memory_space<vmem>>, vector<128x128xf32>,
    %c0_8 = arith.constant 0 : index
    %c0_9 = arith.constant 0 : index
    %9 = vector.load %arg9[%c0_8, %c0_9] : memref<128x128xf32, #tpu.memory_space<vmem>>, vector<128x128xf32>
    %c0_10 = arith.constant 0 : index
    %c0_11 = arith.constant 0 : index
    %10 = vector.load %arg5[%c0_10, %c0_11] : memref<128x128xf32, #tpu.memory_space<vmem>>, vector<128x128xf32>
    %cst_12 = arith.constant dense<0.000000e+00> : vector<128x128xf32>
    %11 = tpu.matmul %3, %10, %cst_12 {dimension_numbers = #tpu.dot_dimension_numbers<[1], [0], [0], [1], [0, 0, 1, 1], [], []>} : vector<128x128xf32>, vector<128x128xf32>, vector<128x128xf32> -> vector<128x128xf32>
    %12 = arith.addf %9, %11 : vector<128x128xf32>
    %c0_13 = arith.constant 0 : index
    %c0_14 = arith.constant 0 : index
    %13 = vector.load %arg9[%c0_13, %c0_14] : memref<128x128xf32, #tpu.memory_space<vmem>>, vector<128x128xf32>
    tpu.vector_store %arg9[%c0_13, %c0_14], %12 {strides = array<i32>} : memref<128x128xf32, #tpu.memory_space<vmem>>, vector<128x128xf32>,
    %c0_i32_15 = arith.constant 0 : i32
    %14 = arith.cmpi eq, %arg2, %c0_i32_15 : i32
    %15 = arith.extui %14 : i1 to i32
    %c0_i32_16 = arith.constant 0 : i32
    %16 = arith.cmpi ne, %15, %c0_i32_16 : i32
    scf.if %16 {
      %c0_17 = arith.constant 0 : index
      %c0_18 = arith.constant 0 : index
      %17 = vector.load %arg8[%c0_17, %c0_18] : memref<128x128xf32, #tpu.memory_space<vmem>>, vector<128x128xf32>
      %c0_19 = arith.constant 0 : index
      %c0_20 = arith.constant 0 : index
      %18 = vector.load %arg6[%c0_19, %c0_20] : memref<1x128xf32, #tpu.memory_space<vmem>>, vector<1x128xf32>
      %19 = vector.broadcast %18 : vector<1x128xf32> to vector<128x128xf32>
      %20 = arith.addf %17, %19 : vector<128x128xf32>
      %cst_21 = arith.constant 0.000000e+00 : f32
      %21 = vector.broadcast %cst_21 : f32 to vector<128x128xf32>
      %22 = arith.maximumf %20, %21 : vector<128x128xf32>
      %c0_22 = arith.constant 0 : index
      %c0_23 = arith.constant 0 : index
      %23 = vector.load %arg9[%c0_22, %c0_23] : memref<128x128xf32, #tpu.memory_space<vmem>>, vector<128x128xf32>
      %24 = arith.addf %23, %22 : vector<128x128xf32>
      %c0_24 = arith.constant 0 : index
      %c0_25 = arith.constant 0 : index
      %25 = vector.load %arg7[%c0_24, %c0_25] : memref<128x128xf32, #tpu.memory_space<vmem>>, vector<128x128xf32>
      tpu.vector_store %arg7[%c0_24, %c0_25], %24 {strides = array<i32>} : memref<128x128xf32, #tpu.memory_space<vmem>>, vector<128x128xf32>,
    } else {
    }
    return
  }
  func.func @transform_0(%arg0: i32, %arg1: i32, %arg2: i32) -> (i32, i32) {
    %c0_i32 = arith.constant 0 : i32
    return %arg0, %arg2 : i32, i32
  }
  func.func @transform_1(%arg0: i32, %arg1: i32, %arg2: i32) -> (i32, i32) {
    %c0_i32 = arith.constant 0 : i32
    return %arg2, %arg1 : i32, i32
  }
  func.func @transform_2(%arg0: i32, %arg1: i32, %arg2: i32) -> (i32, i32) {
    %c0_i32 = arith.constant 0 : i32
    return %arg2, %arg1 : i32, i32
  }
  func.func @transform_3(%arg0: i32, %arg1: i32, %arg2: i32) -> (i32, i32) {
    %c0_i32 = arith.constant 0 : i32
    %c0_i32_0 = arith.constant 0 : i32
    return %c0_i32, %arg1 : i32, i32
  }
  func.func @transform_4(%arg0: i32, %arg1: i32, %arg2: i32) -> (i32, i32) {
    %c0_i32 = arith.constant 0 : i32
    return %arg0, %arg1 : i32, i32
  }
}

</mosaic_0001>

<bundles_post_ra>
// kernel: _residual_call.1
= control target key start
LH: loop header
LB: loop body
LE: loop exit
PB: predicated region body
PF: predicated region fallthrough
CT: control target
= control target key end

     0   :  { %s1288_s15 = smov 0   ;;  %s1290_s16 = smov 0   ;;  %s1484_s0 = inlined_call_operand.vmem [shape: f32[256,128], index: 0, kind: input, shape index: {}]   ;;  %s1485_s1 = inlined_call_operand.vmem [shape: f32[128,128], index: 1, kind: input, shape index: {}]   ;;  %s1486_s2 = inlined_call_operand.vmem [shape: f32[128,128], index: 2, kind: input, shape index: {}]   ;;  %s1487_s3 = inlined_call_operand.vmem [shape: f32[1,128], index: 3, kind: input, shape index: {}]   ;;  %s1488_s4 = inlined_call_operand.vmem [shape: f32[256,128], index: 4, kind: output, shape index: {}]  }
   0x1   :  { %s1292_s17 = smov 0  }
   0x2 LB: > { %s33_s18 = sadd.s32 1, %s1257_s16  ;;  %p1031_p0 = scmp.ge.s32.totalorder %s1261_s17, 1  ;;  %s1261_s17 = sphi %s1292_s17, %s14_s17   ;;  %s1257_s16 = sphi %s1290_s16, %s1490_s16   ;;  %s1253_s15 = sphi %s1288_s15, %s1489_s15  }
   0x3   : > { %p35_p1 = scmp.ge.s32.totalorder %s33_s18, 2  ;;  %p229_p2 = scmp.lt.s32.totalorder %s1261_s17, 3 }
   0x5   : > { %s1492_s18 = smov (%p35_p1, %s33_s18), 0  ;;  %p230_p3 = pnand %p1031_p0, %p229_p2 }
   0x6   : > { %s1032_s25 = sshll.u32 (!%p230_p3), %s1253_s15, 4 }
   0x7   : > { %233 = sbr.rel (%p230_p3) target bundleno = 275 (0x113), region = 36  ;;  %p281_p4 = scmp.lt.s32.totalorder (!%p230_p3), %s1032_s25, 31 }
   0xc   : > { %v402_v0 = vld [vmem:[%s1485_s1 + $0x78] sm:$0xff]  ;;  %v401_v1 = vld [vmem:[%s1485_s1 + $0x70] sm:$0xff]  ;;  %v400_v4 = vld [vmem:[%s1485_s1 + $0x68] sm:$0xff]  ;;  %s1494_s25 = smov (!%p281_p4, %s1032_s25), 31 }
   0xd   : > { %v611_v2 = vld [vmem:[%s1486_s2 + $0x78] sm:$0xff]  ;;  %1103 = vmatprep.subr.mxu0 %v402_v0  ;;  %v610_v3 = vld [vmem:[%s1486_s2 + $0x70] sm:$0xff]  ;;  %v609_v5 = vld [vmem:[%s1486_s2 + $0x68] sm:$0xff]  ;;  %s1033_s23 = sshll.u32 %s1494_s25, 3 }
   0xe   : > { %1159 = vmatprep.subr.mxu1 %v611_v2  ;;  %1104 = vmatpush3.msra.mxu0 %v402_v0  ;;  %v399_v6 = vld [vmem:[%s1485_s1 + $0x60] sm:$0xff]  ;;  %v398_v8 = vld [vmem:[%s1485_s1 + $0x58] sm:$0xff]  ;;  %v397_v10 = vld [vmem:[%s1485_s1 + $0x50] sm:$0xff]  ;;  %s1401_s8 = scalar_lea.vmem %s1484_s0, %s1033_s23  ;;  %s1443_s27 = scalar_lea.vmem %s1488_s4, %s1033_s23 }
   0xf   : > { %1160 = vmatpush3.msra.mxu1 %v611_v2  ;;  %1105 = vmatprep.subr.mxu0 %v401_v1  ;;  %v608_v7 = vld [vmem:[%s1486_s2 + $0x60] sm:$0xff]  ;;  %v607_v9 = vld [vmem:[%s1486_s2 + $0x58] sm:$0xff]  ;;  %v606_v11 = vld [vmem:[%s1486_s2 + $0x50] sm:$0xff] }
  0x10   : > { %1161 = vmatprep.subr.mxu1 %v610_v3  ;;  %1106 = vmatpush3.msra.mxu0 %v401_v1  ;;  %v396_v12 = vld [vmem:[%s1485_s1 + $0x48] sm:$0xff]  ;;  %v395_v14 = vld [vmem:[%s1485_s1 + $0x40] sm:$0xff]  ;;  %v394_v16 = vld [vmem:[%s1485_s1 + $0x38] sm:$0xff] }
  0x11   : > { %1162 = vmatpush3.msra.mxu1 %v610_v3  ;;  %1107 = vmatprep.subr.mxu0 %v400_v4  ;;  %v605_v13 = vld [vmem:[%s1486_s2 + $0x48] sm:$0xff]  ;;  %v604_v15 = vld [vmem:[%s1486_s2 + $0x40] sm:$0xff]  ;;  %v603_v17 = vld [vmem:[%s1486_s2 + $0x38] sm:$0xff] }
  0x12   : > { %1163 = vmatprep.subr.mxu1 %v609_v5  ;;  %1108 = vmatpush3.msra.mxu0 %v400_v4  ;;  %v393_v18 = vld [vmem:[%s1485_s1 + $0x30] sm:$0xff]  ;;  %v392_v20 = vld [vmem:[%s1485_s1 + $0x28] sm:$0xff]  ;;  %v391_v22 = vld [vmem:[%s1485_s1 + $0x20] sm:$0xff] }
  0x13   : > { %1164 = vmatpush3.msra.mxu1 %v609_v5  ;;  %1109 = vmatprep.subr.mxu0 %v399_v6  ;;  %v602_v19 = vld [vmem:[%s1486_s2 + $0x30] sm:$0xff]  ;;  %v601_v21 = vld [vmem:[%s1486_s2 + $0x28] sm:$0xff]  ;;  %v600_v23 = vld [vmem:[%s1486_s2 + $0x20] sm:$0xff] }
  0x14   : > { %1165 = vmatprep.subr.mxu1 %v608_v7  ;;  %1110 = vmatpush3.msra.mxu0 %v399_v6  ;;  %v390_v24 = vld [vmem:[%s1485_s1 + $0x18] sm:$0xff]  ;;  %v389_v26 = vld [vmem:[%s1485_s1 + $0x10] sm:$0xff]  ;;  %v388_v28 = vld [vmem:[%s1485_s1 + $0x8] sm:$0xff] }
  0x15   : > { %1166 = vmatpush3.msra.mxu1 %v608_v7  ;;  %1111 = vmatprep.subr.mxu0 %v398_v8  ;;  %v599_v25 = vld [vmem:[%s1486_s2 + $0x18] sm:$0xff]  ;;  %v598_v27 = vld [vmem:[%s1486_s2 + $0x10] sm:$0xff]  ;;  %v597_v29 = vld [vmem:[%s1486_s2 + $0x8] sm:$0xff] }
  0x16   : > { %1167 = vmatprep.subr.mxu1 %v607_v9  ;;  %1112 = vmatpush3.msra.mxu0 %v398_v8  ;;  %v355_v30 = vld [vmem:[%s1401_s8] sm:$0xff]  ;;  %v356_v33 = vld [vmem:[%s1401_s8 + $0x8] sm:$0xff]  ;;  %v357_v34 = vld [vmem:[%s1401_s8 + $0x10] sm:$0xff] }
  0x17   : > { %1168 = vmatpush3.msra.mxu1 %v607_v9  ;;  %1113 = vmatprep.subr.mxu0 %v397_v10  ;;  %v387_v31 = vld [vmem:[%s1485_s1] sm:$0xff]  ;;  %v358_v35 = vld [vmem:[%s1401_s8 + $0x18] sm:$0xff]  ;;  %v360_v37 = vld [vmem:[%s1401_s8 + $0x28] sm:$0xff] }
  0x18   : > { %1169 = vmatprep.subr.mxu1 %v606_v11  ;;  %1114 = vmatpush3.msra.mxu0 %v397_v10  ;;  %v596_v32 = vld [vmem:[%s1486_s2] sm:$0xff]  ;;  %v361_v38 = vld [vmem:[%s1401_s8 + $0x30] sm:$0xff]  ;;  %v362_v39 = vld [vmem:[%s1401_s8 + $0x38] sm:$0xff] }
  0x19   : > { %1170 = vmatpush3.msra.mxu1 %v606_v11  ;;  %1115 = vmatprep.subr.mxu0 %v396_v12  ;;  %v359_v36 = vld [vmem:[%s1401_s8 + $0x20] sm:$0xff]  ;;  %v364_v41 = vld [vmem:[%s1401_s8 + $0x48] sm:$0xff]  ;;  %v365_v42 = vld [vmem:[%s1401_s8 + $0x50] sm:$0xff] }
  0x1a   : > { %1171 = vmatprep.subr.mxu1 %v605_v13  ;;  %1116 = vmatpush3.msra.mxu0 %v396_v12  ;;  %v363_v40 = vld [vmem:[%s1401_s8 + $0x40] sm:$0xff]  ;;  %v366_v43 = vld [vmem:[%s1401_s8 + $0x58] sm:$0xff]  ;;  %v368_v45 = vld [vmem:[%s1401_s8 + $0x68] sm:$0xff] }
  0x1b   : > { %1172 = vmatpush3.msra.mxu1 %v605_v13  ;;  %1117 = vmatprep.subr.mxu0 %v395_v14  ;;  %v367_v44 = vld [vmem:[%s1401_s8 + $0x60] sm:$0xff]  ;;  %v369_v46 = vld [vmem:[%s1401_s8 + $0x70] sm:$0xff]  ;;  %v370_v47 = vld [vmem:[%s1401_s8 + $0x78] sm:$0xff] }
  0x1c   : > { %1173 = vmatprep.subr.mxu1 %v604_v15  ;;  %1118 = vmatpush3.msra.mxu0 %v395_v14  ;;  %v1434_v48 = vld [vmem:[%s1487_s3] ss:$0 sm:$0xff] }
  0x1d   : > { %1174 = vmatpush3.msra.mxu1 %v604_v15  ;;  %1119 = vmatprep.subr.mxu0 %v394_v16 }
  0x1e   : > { %1175 = vmatprep.subr.mxu1 %v603_v17  ;;  %1120 = vmatpush3.msra.mxu0 %v394_v16 }
  0x1f   : > { %1176 = vmatpush3.msra.mxu1 %v603_v17  ;;  %1121 = vmatprep.subr.mxu0 %v393_v18 }
  0x20   : > { %1177 = vmatprep.subr.mxu1 %v602_v19  ;;  %1122 = vmatpush3.msra.mxu0 %v393_v18 }
  0x21   : > { %1178 = vmatpush3.msra.mxu1 %v602_v19  ;;  %1123 = vmatprep.subr.mxu0 %v392_v20 }
  0x22   : > { %1179 = vmatprep.subr.mxu1 %v601_v21  ;;  %1124 = vmatpush3.msra.mxu0 %v392_v20 }
  0x23   : > { %1180 = vmatpush3.msra.mxu1 %v601_v21  ;;  %1125 = vmatprep.subr.mxu0 %v391_v22 }
  0x24   : > { %1181 = vmatprep.subr.mxu1 %v600_v23  ;;  %1126 = vmatpush3.msra.mxu0 %v391_v22 }
  0x25   : > { %1182 = vmatpush3.msra.mxu1 %v600_v23  ;;  %1127 = vmatprep.subr.mxu0 %v390_v24 }
  0x26   : > { %1183 = vmatprep.subr.mxu1 %v599_v25  ;;  %1128 = vmatpush3.msra.mxu0 %v390_v24 }
  0x27   : > { %1184 = vmatpush3.msra.mxu1 %v599_v25  ;;  %1129 = vmatprep.subr.mxu0 %v389_v26 }
  0x28   : > { %1185 = vmatprep.subr.mxu1 %v598_v27  ;;  %1130 = vmatpush3.msra.mxu0 %v389_v26 }
  0x29   : > { %1186 = vmatpush3.msra.mxu1 %v598_v27  ;;  %1131 = vmatprep.subr.mxu0 %v388_v28 }
  0x2a   : > { %1187 = vmatprep.subr.mxu1 %v597_v29  ;;  %1132 = vmatpush3.msra.mxu0 %v388_v28 }
  0x2b   : > { %1135 = vmatprep.mubr.f32.mxu0 %v355_v30  ;;  %1133 = vmatprep.subr.mxu0 %v387_v31 }
  0x2c   : > { %1188 = vmatpush3.msra.mxu1 %v597_v29  ;;  %1134 = vmatpush3.msra.mxu0 %v387_v31 }
  0x2d   : > { %1189 = vmatprep.subr.mxu1 %v596_v32  ;;  %1136 = vmatmul.mubr.f32.vlgmr.msra.gmra.mxu0 %v356_v33 }
  0x2e   : > { %1190 = vmatpush3.msra.mxu1 %v596_v32  ;;  %1191 = vmatprep.mubr.f32.mxu1 %v355_v30 }
  0x2f   : > { %1138 = vmatprep.mubr.f32.mxu0 %v357_v34  ;;  %1192 = vmatmul.mubr.f32.vlgmr.msra.gmra.mxu1 %v356_v33 }
  0x30   : > { %1194 = vmatprep.mubr.f32.mxu1 %v357_v34 }
  0x31   : > { %1139 = vmatmul.mubr.f32.gmra.mxu0 %v358_v35 }
  0x32   : > { %1141 = vmatprep.mubr.f32.mxu0 %v359_v36 }
  0x33   : > { %1195 = vmatmul.mubr.f32.gmra.mxu1 %v358_v35 }
  0x34   : > { %1197 = vmatprep.mubr.f32.mxu1 %v359_v36 }
  0x35   : > { %1142 = vmatmul.mubr.f32.gmra.mxu0 %v360_v37 }
  0x36   : > { %1144 = vmatprep.mubr.f32.mxu0 %v361_v38 }
  0x37   : > { %1198 = vmatmul.mubr.f32.gmra.mxu1 %v360_v37 }
  0x38   : > { %1200 = vmatprep.mubr.f32.mxu1 %v361_v38 }
  0x39   : > { %1145 = vmatmul.mubr.f32.gmra.mxu0 %v362_v39 }
  0x3a   : > { %1147 = vmatprep.mubr.f32.mxu0 %v363_v40 }
  0x3b   : > { %1201 = vmatmul.mubr.f32.gmra.mxu1 %v362_v39 }
  0x3c   : > { %1203 = vmatprep.mubr.f32.mxu1 %v363_v40 }
  0x3d   : > { %1148 = vmatmul.mubr.f32.gmra.mxu0 %v364_v41 }
  0x3e   : > { %1150 = vmatprep.mubr.f32.mxu0 %v365_v42 }
  0x3f   : > { %1204 = vmatmul.mubr.f32.gmra.mxu1 %v364_v41 }
  0x40   : > { %1206 = vmatprep.mubr.f32.mxu1 %v365_v42 }
  0x41   : > { %1151 = vmatmul.mubr.f32.gmra.mxu0 %v366_v43 }
  0x42   : > { %1153 = vmatprep.mubr.f32.mxu0 %v367_v44 }
  0x43   : > { %1207 = vmatmul.mubr.f32.gmra.mxu1 %v366_v43 }
  0x44   : > { %1209 = vmatprep.mubr.f32.mxu1 %v367_v44 }
  0x45   : > { %1154 = vmatmul.mubr.f32.gmra.mxu0 %v368_v45 }
  0x46   : > { %1156 = vmatprep.mubr.f32.mxu0 %v369_v46 }
  0x47   : > { %1210 = vmatmul.mubr.f32.gmra.mxu1 %v368_v45 }
  0x48   : > { %1212 = vmatprep.mubr.f32.mxu1 %v369_v46 }
  0x49   : > { %1157 = vmatmul.mubr.f32.gmra.mxu0 %v370_v47 }
  0x4b   : > { %1213 = vmatmul.mubr.f32.gmra.mxu1 %v370_v47 }
  0xed   : > { %v1137_v49 = vpop.f32.mrf.mxu0 }
  0xee   : > { %v816_v50 = vadd.f32 %v1137_v49, %v1434_v48 }
  0xef   : > { %v469_v51 = vpop.f32.mrf.mxu0  ;;  %v1193_v52 = vpop.f32.mrf.mxu1 }
  0xf0   : > { %v832_v53 = vmax.f32 %v816_v50, 0.0  ;;  %v815_v54 = vadd.f32 %v1434_v48, %v469_v51 }
  0xf1   : > { %v1140_v55 = vpop.f32.mrf.mxu0  ;;  %v678_v56 = vpop.f32.mrf.mxu1 }
  0xf2   : > { %v831_v57 = vmax.f32 %v815_v54, 0.0  ;;  %v864_v58 = vadd.f32 %v1193_v52, %v832_v53  ;;  %v818_v59 = vadd.f32 %v1140_v55, %v1434_v48 }
  0xf3   : > { %v479_v60 = vpop.f32.mrf.mxu0  ;;  %v1196_v61 = vpop.f32.mrf.mxu1 }
  0xf4   : > { %880 = vst [vmem:[%s1443_s27 + $0x8] sm:$0xff] %v864_v58  ;;  %v834_v62 = vmax.f32 %v818_v59, 0.0  ;;  %v863_v63 = vadd.f32 %v831_v57, %v678_v56  ;;  %v817_v0 = vadd.f32 %v1434_v48, %v479_v60 }
  0xf5   : > { %v1143_v1 = vpop.f32.mrf.mxu0  ;;  %v688_v2 = vpop.f32.mrf.mxu1 }
  0xf6   : > { %879 = vst [vmem:[%s1443_s27] sm:$0xff] %v863_v63  ;;  %v833_v3 = vmax.f32 %v817_v0, 0.0  ;;  %v866_v4 = vadd.f32 %v1196_v61, %v834_v62  ;;  %v820_v5 = vadd.f32 %v1143_v1, %v1434_v48 }
  0xf7   : > { %v489_v6 = vpop.f32.mrf.mxu0  ;;  %v1199_v7 = vpop.f32.mrf.mxu1 }
  0xf8   : > { %882 = vst [vmem:[%s1443_s27 + $0x18] sm:$0xff] %v866_v4  ;;  %v836_v8 = vmax.f32 %v820_v5, 0.0  ;;  %v865_v9 = vadd.f32 %v833_v3, %v688_v2  ;;  %v819_v10 = vadd.f32 %v1434_v48, %v489_v6 }
  0xf9   : > { %v1146_v11 = vpop.f32.mrf.mxu0  ;;  %v698_v12 = vpop.f32.mrf.mxu1 }
  0xfa   : > { %881 = vst [vmem:[%s1443_s27 + $0x10] sm:$0xff] %v865_v9  ;;  %v835_v13 = vmax.f32 %v819_v10, 0.0  ;;  %v868_v14 = vadd.f32 %v1199_v7, %v836_v8  ;;  %v822_v15 = vadd.f32 %v1146_v11, %v1434_v48 }
  0xfb   : > { %v499_v16 = vpop.f32.mrf.mxu0  ;;  %v1202_v17 = vpop.f32.mrf.mxu1 }
  0xfc   : > { %884 = vst [vmem:[%s1443_s27 + $0x28] sm:$0xff] %v868_v14  ;;  %v838_v18 = vmax.f32 %v822_v15, 0.0  ;;  %v867_v19 = vadd.f32 %v835_v13, %v698_v12  ;;  %v821_v20 = vadd.f32 %v1434_v48, %v499_v16 }
  0xfd   : > { %v1149_v21 = vpop.f32.mrf.mxu0  ;;  %v708_v22 = vpop.f32.mrf.mxu1 }
  0xfe   : > { %883 = vst [vmem:[%s1443_s27 + $0x20] sm:$0xff] %v867_v19  ;;  %v837_v23 = vmax.f32 %v821_v20, 0.0  ;;  %v870_v24 = vadd.f32 %v1202_v17, %v838_v18  ;;  %v824_v25 = vadd.f32 %v1149_v21, %v1434_v48 }
  0xff   : > { %v509_v26 = vpop.f32.mrf.mxu0  ;;  %v1205_v27 = vpop.f32.mrf.mxu1 }
 0x100   : > { %886 = vst [vmem:[%s1443_s27 + $0x38] sm:$0xff] %v870_v24  ;;  %v840_v28 = vmax.f32 %v824_v25, 0.0  ;;  %v869_v29 = vadd.f32 %v837_v23, %v708_v22  ;;  %v823_v30 = vadd.f32 %v1434_v48, %v509_v26 }
 0x101   : > { %v1152_v31 = vpop.f32.mrf.mxu0  ;;  %v718_v32 = vpop.f32.mrf.mxu1 }
 0x102   : > { %885 = vst [vmem:[%s1443_s27 + $0x30] sm:$0xff] %v869_v29  ;;  %v839_v33 = vmax.f32 %v823_v30, 0.0  ;;  %v872_v34 = vadd.f32 %v1205_v27, %v840_v28  ;;  %v826_v35 = vadd.f32 %v1152_v31, %v1434_v48 }
 0x103   : > { %v519_v36 = vpop.f32.mrf.mxu0  ;;  %v1208_v37 = vpop.f32.mrf.mxu1 }
 0x104   : > { %888 = vst [vmem:[%s1443_s27 + $0x48] sm:$0xff] %v872_v34  ;;  %v842_v38 = vmax.f32 %v826_v35, 0.0  ;;  %v871_v39 = vadd.f32 %v839_v33, %v718_v32  ;;  %v825_v40 = vadd.f32 %v1434_v48, %v519_v36 }
 0x105   : > { %v1155_v41 = vpop.f32.mrf.mxu0  ;;  %v728_v42 = vpop.f32.mrf.mxu1 }
 0x106   : > { %887 = vst [vmem:[%s1443_s27 + $0x40] sm:$0xff] %v871_v39  ;;  %v841_v43 = vmax.f32 %v825_v40, 0.0  ;;  %v874_v44 = vadd.f32 %v1208_v37, %v842_v38  ;;  %v828_v45 = vadd.f32 %v1155_v41, %v1434_v48 }
 0x107   : > { %v529_v46 = vpop.f32.mrf.mxu0  ;;  %v1211_v47 = vpop.f32.mrf.mxu1 }
 0x108   : > { %890 = vst [vmem:[%s1443_s27 + $0x58] sm:$0xff] %v874_v44  ;;  %v844_v49 = vmax.f32 %v828_v45, 0.0  ;;  %v873_v50 = vadd.f32 %v841_v43, %v728_v42  ;;  %v827_v51 = vadd.f32 %v1434_v48, %v529_v46 }
 0x109   : > { %v1158_v52 = vpop.f32.mrf.mxu0  ;;  %v738_v53 = vpop.f32.mrf.mxu1 }
 0x10a   : > { %889 = vst [vmem:[%s1443_s27 + $0x50] sm:$0xff] %v873_v50  ;;  %v843_v54 = vmax.f32 %v827_v51, 0.0  ;;  %v876_v55 = vadd.f32 %v1211_v47, %v844_v49  ;;  %v830_v56 = vadd.f32 %v1158_v52, %v1434_v48 }
 0x10b   : > { %v539_v57 = vpop.f32.mrf.mxu0  ;;  %v1214_v58 = vpop.f32.mrf.mxu1 }
 0x10c   : > { %892 = vst [vmem:[%s1443_s27 + $0x68] sm:$0xff] %v876_v55  ;;  %v846_v59 = vmax.f32 %v830_v56, 0.0  ;;  %v875_v60 = vadd.f32 %v843_v54, %v738_v53  ;;  %v829_v61 = vadd.f32 %v1434_v48, %v539_v57 }
 0x10d   : > { %v748_v0 = vpop.f32.mrf.mxu1 }
 0x10e   : > { %891 = vst [vmem:[%s1443_s27 + $0x60] sm:$0xff] %v875_v60  ;;  %v845_v62 = vmax.f32 %v829_v61, 0.0  ;;  %v878_v63 = vadd.f32 %v1214_v58, %v846_v59 }
 0x110   : > { %894 = vst [vmem:[%s1443_s27 + $0x78] sm:$0xff] %v878_v63  ;;  %v877_v1 = vadd.f32 %v845_v62, %v748_v0 }
 0x112   : > { %893 = vst [vmem:[%s1443_s27 + $0x70] sm:$0xff] %v877_v1 }
 0x113 PF: > { %s14_s17 = sadd.s32 1, %s1261_s17   ;;  %s1489_s15 = smov %s1257_s16 }
 0x114   : > { %p11_p5 = scmp.ge.s32.totalorder %s14_s17, 4   ;;  %s1490_s16 = smov %s1492_s18 }
 0x116   :  { %13 = sbr.rel (!%p11_p5) target bundleno = 2 (0x2), region = 83 }

</bundles_post_ra>
